<compile_context>
chip_gen: v7x
topology: tpu7x:2x2x1
jax: 0.10.0
libtpu: 0.0.40
codegen_flags: <defaults>
</compile_context>

<pallas_src>
import numpy as np
import jax
import jax.numpy as jnp
from jax.experimental import pallas as pl
from jax.experimental.pallas import tpu as pltpu


_P3D_TO_WORLD = np.array([[0.0, -1.0, 0.0],
                          [1.0,  0.0, 0.0],
                          [0.0,  0.0, 1.0]], dtype=np.float32)

_LANES = 128       # points per row (lane dimension)
_ROW_TILE = 256    # rows of 128 points per grid step (~2 MiB input slab per step)


# --------------------------------------------------------------------------------------
# Camera setup "glue" (deterministic, host-side numpy). This replaces the pytorch3d
# look_at_view_transform / PerspectiveCameras construction done in _setup_camera().
# TODO(synk): carla sensor attribute parsing is replaced by deterministic constants.
# --------------------------------------------------------------------------------------
def _look_at_view_transform(eye, at, up):
    """NumPy port of pytorch3d look_at_view_transform for a single camera."""
    eye = np.asarray(eye, np.float32).reshape(1, 3)
    at = np.asarray(at, np.float32).reshape(1, 3)
    up = np.asarray(up, np.float32).reshape(1, 3)

    def _norm(v, eps=1e-5):
        n = np.linalg.norm(v, axis=-1, keepdims=True)
        return v / np.maximum(n, eps)

    z_axis = _norm(at - eye)
    x_axis = _norm(np.cross(up, z_axis))
    y_axis = _norm(np.cross(z_axis, x_axis))
    if np.all(np.isclose(x_axis, 0.0, atol=5e-3)):
        x_axis = _norm(np.cross(y_axis, z_axis))
    R = np.concatenate([x_axis[:, None], y_axis[:, None], z_axis[:, None]], axis=1)
    R = np.transpose(R, (0, 2, 1))                      # x_view = x_world @ R + T
    T = -np.einsum('nji,nj->ni', R, eye)
    return R[0].astype(np.float32), T[0].astype(np.float32)


def _setup_camera(image_size=(800, 600), fov_deg=90.0, lens_x_size=0.08,
                  camera_position=(3.1, 0.0, 1.2), look_at=(0.0, 0.0, -1.2)):
    distance, shift, elevation = camera_position
    eye = (distance, shift, -elevation)
    R, T = _look_at_view_transform(eye=eye, at=look_at, up=(0.0, 0.0, -1.0))
    sensor_width_mm = lens_x_size * 1000.0
    focal_length_mm = sensor_width_mm / (2.0 * np.tan(np.deg2rad(fov_deg) / 2.0))
    focal = np.float32(focal_length_mm * 10.0)          # fx = fy (screen-space pixels)
    px = np.float32(image_size[0] / 2.0)
    py = np.float32(image_size[1] / 2.0)
    return R, T, focal, focal, px, py


# --------------------------------------------------------------------------------------
# Pallas kernel: each grid step processes a (ROW_TILE, 128) plane of points.
# Slab row layout (per point, lane-expanded in the wrapper):
#   rows 0..2   : x coordinates x0, x1, x2
#   rows 3..11  : M'[i, c] at row 3 + 3*i + c   (columns 0/1 already scaled by -fx/-fy)
#   rows 12..14 : t'[c]                         (same column scaling)
# Output planes: row 0 = screen_x, row 1 = screen_y, row 2 = 1/view_z.
# --------------------------------------------------------------------------------------
def _pose_projection_kernel(cam_ref, s_ref, o_ref):
    px = cam_ref[0]
    py = cam_ref[1]

    x0 = s_ref[0]                                   # (TR, 128)
    x1 = s_ref[1]
    x2 = s_ref[2]

    # view' = x @ M' + t'  as pure VPU FMAs (column-scaled, so no fx/fy muls here).
    v0 = x0 * s_ref[3] + x1 * s_ref[6] + x2 * s_ref[9] + s_ref[12]    # -fx * view_x
    v1 = x0 * s_ref[4] + x1 * s_ref[7] + x2 * s_ref[10] + s_ref[13]   # -fy * view_y
    v2 = x0 * s_ref[5] + x1 * s_ref[8] + x2 * s_ref[11] + s_ref[14]   # view_z

    inv_z = pl.reciprocal(v2, approx=True)          # EUP slot
    inv_z = inv_z * (2.0 - v2 * inv_z)              # one Newton step -> ~f32-exact 1/z

    o_ref[0] = px + v0 * inv_z                      # screen x
    o_ref[1] = py + v1 * inv_z                      # screen y
    o_ref[2] = inv_z                                # inverse depth


def _round_up(a, b):
    return ((a + b - 1) // b) * b


def p3d_pose_projection(x, loc, rot, cam_R, cam_T, fx, fy, px, py):
    """x: (N,B,3), loc: (N,3), rot: (N,3,3) -> (N,B,3) screen points ([..., :2] usable)."""
    N, B, _ = x.shape
    hi = jax.lax.Precision.HIGHEST

    x = x.astype(jnp.float32)
    loc = loc.astype(jnp.float32)
    rot = rot.astype(jnp.float32)
    cam_R = jnp.asarray(cam_R, jnp.float32)
    cam_T = jnp.asarray(cam_T, jnp.float32)

    # ---- Fold the whole transform chain (wrapper-side, cheap Nx3x3 einsums) ----------
    P = jnp.asarray(_P3D_TO_WORLD)
    M = jnp.einsum('ij,njk,kl->nil', P, rot, cam_R, precision=hi)     # (N, 3, 3)
    t = jnp.einsum('ni,ij->nj', loc, cam_R, precision=hi) + cam_T[None, :]   # (N, 3)
    col_scale = jnp.asarray([-float(fx), -float(fy), 1.0], jnp.float32)
    M = M * col_scale[None, None, :]                                  # scale columns 0/1
    t = t * col_scale[None, :]

    # ---- Lane-dense slab: 15 per-point scalars, points on (rows, 128) planes ---------
    P_pts = N * B
    rows = max(1, (P_pts + _LANES - 1) // _LANES)
    if rows <= _ROW_TILE:
        tr = _round_up(rows, 8)
        rows_padded = tr
    else:
        tr = _ROW_TILE
        rows_padded = _round_up(rows, _ROW_TILE)
    grid = rows_padded // tr
    P_pad = rows_padded * _LANES

    x_pts = x.reshape(P_pts, 3)
    M_pts = jnp.broadcast_to(M[:, None, :, :], (N, B, 3, 3)).reshape(P_pts, 9)
    t_pts = jnp.broadcast_to(t[:, None, :], (N, B, 3)).reshape(P_pts, 3)
    slab_pts = jnp.concatenate([x_pts, M_pts, t_pts], axis=1)         # (P_pts, 15)

    pad_n = P_pad - P_pts
    if pad_n:
        # padded points: x = 0, M = 0, t = (0, 0, 1) -> view_z = 1, output stays finite
        pad_row = jnp.zeros((15,), jnp.float32).at[14].set(1.0)
        slab_pts = jnp.concatenate(
            [slab_pts, jnp.broadcast_to(pad_row, (pad_n, 15))], axis=0)

    slab = slab_pts.T.reshape(15, rows_padded, _LANES)                # (15, R, 128)
    cam = jnp.asarray([px, py], jnp.float32)                          # SMEM scalars

    out_planes = pl.pallas_call(
        _pose_projection_kernel,
        out_shape=jax.ShapeDtypeStruct((3, rows_padded, _LANES), jnp.float32),
        grid=(grid,),
        in_specs=[
            pl.BlockSpec(memory_space=pltpu.MemorySpace.SMEM),        # px, py
            pl.BlockSpec((15, tr, _LANES), lambda r: (0, r, 0)),      # stacked slab
        ],
        out_specs=pl.BlockSpec((3, tr, _LANES), lambda r: (0, r, 0)),
        compiler_params=pltpu.CompilerParams(dimension_semantics=("parallel",)),
    )(cam, slab)

    # Unpack lane-dense planes back to the module's (N, B, 3) layout.
    out = out_planes.reshape(3, P_pad)[:, :P_pts].T.reshape(N, B, 3)
    return out


# --------------------------------------------------------------------------------------
# Pure-JAX reference (direct translation of the PyTorch math) for validation.
# --------------------------------------------------------------------------------------
def _reference(x, loc, rot, cam_R, cam_T, fx, fy, px, py):
    hi = jax.lax.Precision.HIGHEST
    P = jnp.asarray(_P3D_TO_WORLD)
    world_x = jnp.einsum('nbi,ij->nbj', x, P, precision=hi)
    world_pos = jnp.einsum('nbi,nij->nbj', world_x, rot, precision=hi) + loc[:, None, :]
    view = jnp.einsum('nbi,ij->nbj', world_pos, cam_R, precision=hi) + cam_T[None, None, :]
    zv = view[..., 2:3]
    xs = px - fx * view[..., 0:1] / zv
    ys = py - fy * view[..., 1:2] / zv
    return jnp.concatenate([xs, ys, 1.0 / zv], axis=-1)


if __name__ == "__main__":
    key = jax.random.PRNGKey(0)
    N, B = 2, 26                      # 2 poses, 26 skeleton joints, 3 coords each
    k1, k2, k3 = jax.random.split(key, 3)

    x = 0.3 * jax.random.normal(k1, (N, B, 3), jnp.float32)          # absolute pose
    loc = 0.2 * jax.random.normal(k2, (N, 3), jnp.float32)           # pedestrian world loc
    ang = jax.random.uniform(k3, (N,), jnp.float32, -np.pi, np.pi)   # yaw rotations
    c, s = jnp.cos(ang), jnp.sin(ang)
    z, o = jnp.zeros_like(ang), jnp.ones_like(ang)
    rot = jnp.stack([jnp.stack([c, -s, z], -1),
                     jnp.stack([s,  c, z], -1),
                     jnp.stack([z,  z, o], -1)], axis=-2)            # (N, 3, 3)

    cam_R_np, cam_T_np, fx, fy, px, py = _setup_camera()
    cam_R = jnp.asarray(cam_R_np)
    cam_T = jnp.asarray(cam_T_np)

    out = p3d_pose_projection(x, loc, rot, cam_R, cam_T, fx, fy, px, py)
    out = jax.block_until_ready(out)

    ref = _reference(x, loc, rot, cam_R, cam_T, fx, fy, px, py)
    assert out.shape == (N, B, 3)
    assert bool(jnp.all(jnp.isfinite(out)))
    np.testing.assert_allclose(np.asarray(out), np.asarray(ref), rtol=2e-5, atol=1e-3)

    print("KERNEL_OK")
</pallas_src>

<mosaic_0001>
module attributes {stable_mosaic.version = 11 : i64} {
  func.func @_pose_projection_kernel(%arg0: i32, %arg1: memref<2xf32, #tpu.memory_space<smem>>, %arg2: memref<15x8x128xf32, #tpu.memory_space<vmem>>, %arg3: memref<3x8x128xf32, #tpu.memory_space<vmem>>) attributes {dimension_semantics = [#tpu.dimension_semantics<parallel>], iteration_bounds = array<i64: 1>, scalar_prefetch = 0 : i64, scratch_operands = 0 : i64, tpu.core_type = #tpu.core_type<tc>, window_params = [{transform_indices = @transform_0, window_bounds = array<i64: 2>}, {transform_indices = @transform_1, window_bounds = array<i64: 15, 8, 128>}, {transform_indices = @transform_2, window_bounds = array<i64: 3, 8, 128>}]} {
    %c0 = arith.constant 0 : index
    %0 = memref.load %arg1[%c0] : memref<2xf32, #tpu.memory_space<smem>>
    %c1 = arith.constant 1 : index
    %1 = memref.load %arg1[%c1] : memref<2xf32, #tpu.memory_space<smem>>
    %c0_0 = arith.constant 0 : index
    %c0_1 = arith.constant 0 : index
    %c0_2 = arith.constant 0 : index
    %2 = vector.load %arg2[%c0_0, %c0_1, %c0_2] : memref<15x8x128xf32, #tpu.memory_space<vmem>>, vector<1x8x128xf32>
    %3 = vector.shape_cast %2 : vector<1x8x128xf32> to vector<8x128xf32>
    %c1_3 = arith.constant 1 : index
    %c0_4 = arith.constant 0 : index
    %c0_5 = arith.constant 0 : index
    %4 = vector.load %arg2[%c1_3, %c0_4, %c0_5] : memref<15x8x128xf32, #tpu.memory_space<vmem>>, vector<1x8x128xf32>
    %5 = vector.shape_cast %4 : vector<1x8x128xf32> to vector<8x128xf32>
    %c2 = arith.constant 2 : index
    %c0_6 = arith.constant 0 : index
    %c0_7 = arith.constant 0 : index
    %6 = vector.load %arg2[%c2, %c0_6, %c0_7] : memref<15x8x128xf32, #tpu.memory_space<vmem>>, vector<1x8x128xf32>
    %7 = vector.shape_cast %6 : vector<1x8x128xf32> to vector<8x128xf32>
    %c3 = arith.constant 3 : index
    %c0_8 = arith.constant 0 : index
    %c0_9 = arith.constant 0 : index
    %8 = vector.load %arg2[%c3, %c0_8, %c0_9] : memref<15x8x128xf32, #tpu.memory_space<vmem>>, vector<1x8x128xf32>
    %9 = vector.shape_cast %8 : vector<1x8x128xf32> to vector<8x128xf32>
    %10 = arith.mulf %3, %9 : vector<8x128xf32>
    %c6 = arith.constant 6 : index
    %c0_10 = arith.constant 0 : index
    %c0_11 = arith.constant 0 : index
    %11 = vector.load %arg2[%c6, %c0_10, %c0_11] : memref<15x8x128xf32, #tpu.memory_space<vmem>>, vector<1x8x128xf32>
    %12 = vector.shape_cast %11 : vector<1x8x128xf32> to vector<8x128xf32>
    %13 = arith.mulf %5, %12 : vector<8x128xf32>
    %14 = arith.addf %10, %13 : vector<8x128xf32>
    %c9 = arith.constant 9 : index
    %c0_12 = arith.constant 0 : index
    %c0_13 = arith.constant 0 : index
    %15 = vector.load %arg2[%c9, %c0_12, %c0_13] : memref<15x8x128xf32, #tpu.memory_space<vmem>>, vector<1x8x128xf32>
    %16 = vector.shape_cast %15 : vector<1x8x128xf32> to vector<8x128xf32>
    %17 = arith.mulf %7, %16 : vector<8x128xf32>
    %18 = arith.addf %14, %17 : vector<8x128xf32>
    %c12 = arith.constant 12 : index
    %c0_14 = arith.constant 0 : index
    %c0_15 = arith.constant 0 : index
    %19 = vector.load %arg2[%c12, %c0_14, %c0_15] : memref<15x8x128xf32, #tpu.memory_space<vmem>>, vector<1x8x128xf32>
    %20 = vector.shape_cast %19 : vector<1x8x128xf32> to vector<8x128xf32>
    %21 = arith.addf %18, %20 : vector<8x128xf32>
    %c4 = arith.constant 4 : index
    %c0_16 = arith.constant 0 : index
    %c0_17 = arith.constant 0 : index
    %22 = vector.load %arg2[%c4, %c0_16, %c0_17] : memref<15x8x128xf32, #tpu.memory_space<vmem>>, vector<1x8x128xf32>
    %23 = vector.shape_cast %22 : vector<1x8x128xf32> to vector<8x128xf32>
    %24 = arith.mulf %3, %23 : vector<8x128xf32>
    %c7 = arith.constant 7 : index
    %c0_18 = arith.constant 0 : index
    %c0_19 = arith.constant 0 : index
    %25 = vector.load %arg2[%c7, %c0_18, %c0_19] : memref<15x8x128xf32, #tpu.memory_space<vmem>>, vector<1x8x128xf32>
    %26 = vector.shape_cast %25 : vector<1x8x128xf32> to vector<8x128xf32>
    %27 = arith.mulf %5, %26 : vector<8x128xf32>
    %28 = arith.addf %24, %27 : vector<8x128xf32>
    %c10 = arith.constant 10 : index
    %c0_20 = arith.constant 0 : index
    %c0_21 = arith.constant 0 : index
    %29 = vector.load %arg2[%c10, %c0_20, %c0_21] : memref<15x8x128xf32, #tpu.memory_space<vmem>>, vector<1x8x128xf32>
    %30 = vector.shape_cast %29 : vector<1x8x128xf32> to vector<8x128xf32>
    %31 = arith.mulf %7, %30 : vector<8x128xf32>
    %32 = arith.addf %28, %31 : vector<8x128xf32>
    %c13 = arith.constant 13 : index
    %c0_22 = arith.constant 0 : index
    %c0_23 = arith.constant 0 : index
    %33 = vector.load %arg2[%c13, %c0_22, %c0_23] : memref<15x8x128xf32, #tpu.memory_space<vmem>>, vector<1x8x128xf32>
    %34 = vector.shape_cast %33 : vector<1x8x128xf32> to vector<8x128xf32>
    %35 = arith.addf %32, %34 : vector<8x128xf32>
    %c5 = arith.constant 5 : index
    %c0_24 = arith.constant 0 : index
    %c0_25 = arith.constant 0 : index
    %36 = vector.load %arg2[%c5, %c0_24, %c0_25] : memref<15x8x128xf32, #tpu.memory_space<vmem>>, vector<1x8x128xf32>
    %37 = vector.shape_cast %36 : vector<1x8x128xf32> to vector<8x128xf32>
    %38 = arith.mulf %3, %37 : vector<8x128xf32>
    %c8 = arith.constant 8 : index
    %c0_26 = arith.constant 0 : index
    %c0_27 = arith.constant 0 : index
    %39 = vector.load %arg2[%c8, %c0_26, %c0_27] : memref<15x8x128xf32, #tpu.memory_space<vmem>>, vector<1x8x128xf32>
    %40 = vector.shape_cast %39 : vector<1x8x128xf32> to vector<8x128xf32>
    %41 = arith.mulf %5, %40 : vector<8x128xf32>
    %42 = arith.addf %38, %41 : vector<8x128xf32>
    %c11 = arith.constant 11 : index
    %c0_28 = arith.constant 0 : index
    %c0_29 = arith.constant 0 : index
    %43 = vector.load %arg2[%c11, %c0_28, %c0_29] : memref<15x8x128xf32, #tpu.memory_space<vmem>>, vector<1x8x128xf32>
    %44 = vector.shape_cast %43 : vector<1x8x128xf32> to vector<8x128xf32>
    %45 = arith.mulf %7, %44 : vector<8x128xf32>
    %46 = arith.addf %42, %45 : vector<8x128xf32>
    %c14 = arith.constant 14 : index
    %c0_30 = arith.constant 0 : index
    %c0_31 = arith.constant 0 : index
    %47 = vector.load %arg2[%c14, %c0_30, %c0_31] : memref<15x8x128xf32, #tpu.memory_space<vmem>>, vector<1x8x128xf32>
    %48 = vector.shape_cast %47 : vector<1x8x128xf32> to vector<8x128xf32>
    %49 = arith.addf %46, %48 : vector<8x128xf32>
    %50 = tpu.reciprocal %49 {approx = true} : vector<8x128xf32> -> vector<8x128xf32>
    %51 = arith.mulf %49, %50 : vector<8x128xf32>
    %cst = arith.constant 2.000000e+00 : f32
    %52 = vector.broadcast %cst : f32 to vector<8x128xf32>
    %53 = arith.subf %52, %51 : vector<8x128xf32>
    %54 = arith.mulf %50, %53 : vector<8x128xf32>
    %55 = arith.mulf %21, %54 : vector<8x128xf32>
    %56 = vector.broadcast %0 : f32 to vector<8x128xf32>
    %57 = arith.addf %56, %55 : vector<8x128xf32>
    %c0_32 = arith.constant 0 : index
    %c0_33 = arith.constant 0 : index
    %c0_34 = arith.constant 0 : index
    %58 = vector.load %arg3[%c0_32, %c0_33, %c0_34] : memref<3x8x128xf32, #tpu.memory_space<vmem>>, vector<1x8x128xf32>
    %59 = vector.shape_cast %58 : vector<1x8x128xf32> to vector<8x128xf32>
    %60 = vector.shape_cast %57 : vector<8x128xf32> to vector<1x8x128xf32>
    tpu.vector_store %arg3[%c0_32, %c0_33, %c0_34], %60 {strides = array<i32>} : memref<3x8x128xf32, #tpu.memory_space<vmem>>, vector<1x8x128xf32>,
    %61 = arith.mulf %35, %54 : vector<8x128xf32>
    %62 = vector.broadcast %1 : f32 to vector<8x128xf32>
    %63 = arith.addf %62, %61 : vector<8x128xf32>
    %c1_35 = arith.constant 1 : index
    %c0_36 = arith.constant 0 : index
    %c0_37 = arith.constant 0 : index
    %64 = vector.load %arg3[%c1_35, %c0_36, %c0_37] : memref<3x8x128xf32, #tpu.memory_space<vmem>>, vector<1x8x128xf32>
    %65 = vector.shape_cast %64 : vector<1x8x128xf32> to vector<8x128xf32>
    %66 = vector.shape_cast %63 : vector<8x128xf32> to vector<1x8x128xf32>
    tpu.vector_store %arg3[%c1_35, %c0_36, %c0_37], %66 {strides = array<i32>} : memref<3x8x128xf32, #tpu.memory_space<vmem>>, vector<1x8x128xf32>,
    %c2_38 = arith.constant 2 : index
    %c0_39 = arith.constant 0 : index
    %c0_40 = arith.constant 0 : index
    %67 = vector.load %arg3[%c2_38, %c0_39, %c0_40] : memref<3x8x128xf32, #tpu.memory_space<vmem>>, vector<1x8x128xf32>
    %68 = vector.shape_cast %67 : vector<1x8x128xf32> to vector<8x128xf32>
    %69 = vector.shape_cast %54 : vector<8x128xf32> to vector<1x8x128xf32>
    tpu.vector_store %arg3[%c2_38, %c0_39, %c0_40], %69 {strides = array<i32>} : memref<3x8x128xf32, #tpu.memory_space<vmem>>, vector<1x8x128xf32>,
    return
  }
  func.func @transform_0(%arg0: i32) -> i32 {
    %c0_i32 = arith.constant 0 : i32
    %c0_i32_0 = arith.constant 0 : i32
    return %c0_i32 : i32
  }
  func.func @transform_1(%arg0: i32) -> (i32, i32, i32) {
    %c0_i32 = arith.constant 0 : i32
    %c0_i32_0 = arith.constant 0 : i32
    %c0_i32_1 = arith.constant 0 : i32
    return %c0_i32, %arg0, %c0_i32_0 : i32, i32, i32
  }
  func.func @transform_2(%arg0: i32) -> (i32, i32, i32) {
    %c0_i32 = arith.constant 0 : i32
    %c0_i32_0 = arith.constant 0 : i32
    %c0_i32_1 = arith.constant 0 : i32
    return %c0_i32, %arg0, %c0_i32_0 : i32, i32, i32
  }
}

</mosaic_0001>

<bundles_post_ra>
// kernel: tpu_custom_call.1
= control target key start
LH: loop header
LB: loop body
LE: loop exit
PB: predicated region body
PF: predicated region fallthrough
CT: control target
= control target key end

     0   :  { %7 = vsyncpa [#allocation5], 0  ;;  %s249_s0 = inlined_call_operand.hbm [shape: f32[2], index: 0, kind: input, shape index: {}]   ;;  %s250_s1 = inlined_call_operand.hbm [shape: f32[15,8,128], index: 1, kind: input, shape index: {}]   ;;  %s251_s2 = inlined_call_operand.hbm [shape: f32[3,8,128], index: 2, kind: output, shape index: {}]  }
   0x1   :  { %8 = vsyncpa [#allocation3], 0 }
   0x2   :  { %9 = vsyncpa [#allocation4], 0  ;;  %s127_s11 = scalar_lea.hbm %s249_s0, 16 }
   0x3   :  { %p128_p0 = scmp.ne.s32.totalorder %s249_s0, %s127_s11  ;;  %p131_p1 = scmp.lt.u32.totalorder %s127_s11, %s249_s0 }
   0x5   :  { %p133_p2 = pnand %p131_p1, %p128_p0 }
   0x7   :  { %136 = shalt.err (!%p133_p2)
}
   0x8   :  { %s187_s16 = smov [#allocation2]   ;;  %s188_s19 = smov [#allocation6]  }
   0x9   :  { %17 = dma.hbm_to_smem %s249_s0, 16, %s187_s16, [#allocation5]  }
   0xa   :  { %s23_s20 = sshll.u32 %s188_s19, 4  ;;  %s137_s23 = scalar_lea.hbm %s250_s1, 1920  ;;  %s24_s20 = int_to_ptr.vmem [resolvable:$true] %s23_s20 }
   0xb   :  { %p138_p3 = scmp.ne.s32.totalorder %s250_s1, %s137_s23  ;;  %p141_p4 = scmp.lt.u32.totalorder %s137_s23, %s250_s1 }
   0xd   :  { %p143_p5 = pnand %p141_p4, %p138_p3 }
   0xf   :  { %146 = shalt.err (!%p143_p5)
}
  0x10   :  { %s147_s28 = scalar_lea.vmem %s24_s20, 1920  ;;  %p152_p7 = scmp.lt.s32.totalorder %s24_s20, %s24_s20 }
  0x11   :  { %p148_p6 = scmp.ne.s32.totalorder %s24_s20, %s147_s28  ;;  %p153_p8 = scmp.lt.s32.totalorder %s147_s28, %s147_s28 }
  0x13   :  { %p154_p9 = por %p153_p8, %p152_p7 }
  0x15   :  { %p155_p10 = pnand %p154_p9, %p148_p6 }
  0x17   :  { %158 = shalt.err (!%p155_p10)
}
  0x18   :  { %s189_s0 = smov 128   ;;  %s190_s29 = smov 8  }
  0x19   :  { %29 = dma.hbm_to_vmem [thread:$0]  %s250_s1, 1920, %s24_s20, [#allocation3], %s189_s0, %s189_s0, %s190_s29  }
  0x1a   :  { %181 = dma.done.wait [#allocation5], 16  }
  0x1b   :  { %182 = vsyncadd [#allocation5], 4294967280 }
  0x1c   :  { %183 = dma.done.wait [#allocation3], 1920  }
  0x1d   :  { %184 = vsyncadd [#allocation3], 4294965376 }
  0x1e   :  { %36 = sfence }
  0x1f   :  { %v39_v0 = vld [vmem:[#allocation6] sm:$0xff]  ;;  %v41_v1 = vld [vmem:[#allocation6 + $0x8] sm:$0xff]  ;;  %v43_v2 = vld [vmem:[#allocation6 + $0x10] sm:$0xff]  ;;  %s37_s1 = sld [smem:[#allocation2]]  ;;  %s119_s4 = sld [smem:[#allocation2 + $0x1]] }
  0x20   :  { %v73_v3 = vld [vmem:[#allocation6 + $0x28] sm:$0xff]  ;;  %v76_v4 = vld [vmem:[#allocation6 + $0x40] sm:$0xff]  ;;  %v80_v7 = vld [vmem:[#allocation6 + $0x58] sm:$0xff]  ;;  %s191_s5 = smov [#allocation7]  }
  0x21   :  { %v74_v5 = vmul.f32 %v73_v3, %v39_v0  ;;  %v77_v6 = vmul.f32 %v76_v4, %v41_v1  ;;  %v81_v8 = vmul.f32 %v80_v7, %v43_v2  ;;  %v84_v10 = vld [vmem:[#allocation6 + $0x70] sm:$0xff]  ;;  %v45_v12 = vld [vmem:[#allocation6 + $0x18] sm:$0xff]  ;;  %v59_v15 = vld [vmem:[#allocation6 + $0x20] sm:$0xff]  ;;  %s106_s6 = sshll.u32 %s191_s5, 4  ;;  %s107_s6 = int_to_ptr.vmem [resolvable:$true] %s106_s6 }
  0x22   :  { %v48_v13 = vld [vmem:[#allocation6 + $0x30] sm:$0xff]  ;;  %v62_v16 = vld [vmem:[#allocation6 + $0x38] sm:$0xff]  ;;  %v46_v17 = vmul.f32 %v45_v12, %v39_v0  ;;  %v60_v19 = vmul.f32 %v59_v15, %v39_v0  ;;  %v52_v21 = vld [vmem:[#allocation6 + $0x48] sm:$0xff]  ;;  %s159_s7 = scalar_lea.vmem %s107_s6, 384  ;;  %p164_p12 = scmp.lt.s32.totalorder %s107_s6, %s107_s6 }
  0x23   :  { %v78_v9 = vadd.f32 %v77_v6, %v74_v5  ;;  %v49_v18 = vmul.f32 %v48_v13, %v41_v1  ;;  %v63_v20 = vmul.f32 %v62_v16, %v41_v1  ;;  %v66_v22 = vld [vmem:[#allocation6 + $0x50] sm:$0xff]  ;;  %v53_v24 = vmul.f32 %v52_v21, %v43_v2  ;;  %v56_v30 = vld [vmem:[#allocation6 + $0x60] sm:$0xff]  ;;  %v70_v31 = vld [vmem:[#allocation6 + $0x68] sm:$0xff]  ;;  %p160_p11 = scmp.ne.s32.totalorder %s107_s6, %s159_s7  ;;  %p165_p13 = scmp.lt.s32.totalorder %s159_s7, %s159_s7 }
  0x24   :  { %v67_v26 = vmul.f32 %v66_v22, %v43_v2 }
  0x25   :  { %v82_v11 = vadd.f32 %v81_v8, %v78_v9  ;;  %v50_v23 = vadd.f32 %v49_v18, %v46_v17  ;;  %v64_v25 = vadd.f32 %v63_v20, %v60_v19  ;;  %v91_v37 = vstv %s37_s1  ;;  %p166_p0 = por %p165_p13, %p164_p12 }
  0x26   :  { %v95_v38 = vstv %s119_s4 }
  0x27   :  { %v85_v14 = vadd.f32 %v84_v10, %v82_v11  ;;  %v54_v27 = vadd.f32 %v53_v24, %v50_v23  ;;  %v68_v28 = vadd.f32 %v67_v26, %v64_v25  ;;  %p167_p1 = pnand %p166_p0, %p160_p11 }
  0x29   :  { %125 = vrcp.f32 %v85_v14  ;;  %v57_v33 = vadd.f32 %v56_v30, %v54_v27  ;;  %v71_v35 = vadd.f32 %v70_v31, %v68_v28 }
  0x33   :  { %v126_v29 = vpop.eup %125 }
  0x34   :  { %v87_v32 = vmul.f32 %v126_v29, %v85_v14 }
  0x36   :  { %v88_v34 = vsub.f32 2.0, %v87_v32 }
  0x38   :  { %v89_v36 = vmul.f32 %v126_v29, %v88_v34 }
  0x3a   :  { %v90_v39 = vmul.f32 %v89_v36, %v57_v33  ;;  %100 = vst [vmem:[#allocation7 + $0x10] sm:$0xff] %v89_v36  ;;  %v94_v40 = vmul.f32 %v89_v36, %v71_v35 }
  0x3c   :  { %v92_v41 = vadd.f32 %v91_v37, %v90_v39  ;;  %v96_v42 = vadd.f32 %v95_v38, %v94_v40 }
  0x3e   :  { %93 = vst [vmem:[#allocation7] sm:$0xff] %v92_v41  ;;  %98 = vst [vmem:[#allocation7 + $0x8] sm:$0xff] %v96_v42 }
  0x3f   :  { %170 = shalt.err (!%p167_p1)
}
  0x40   :  { %s171_s10 = scalar_lea.hbm %s251_s2, 384 }
  0x41   :  { %p172_p2 = scmp.ne.s32.totalorder %s251_s2, %s171_s10  ;;  %p175_p3 = scmp.lt.u32.totalorder %s171_s10, %s251_s2 }
  0x43   :  { %p177_p4 = pnand %p175_p3, %p172_p2 }
  0x45   :  { %180 = shalt.err (!%p177_p4)
}
  0x46   :  { %112 = dma.vmem_to_hbm [thread:$0]  %s107_s6, 384, %s251_s2, [#allocation4], %s189_s0, %s189_s0, %s190_s29  }
  0x47   :  { %185 = dma.done.wait [#allocation4], 384  }
  0x48   :  { %186 = vsyncadd [#allocation4], 4294966912 }
  0x49   :  { %116 = vsyncpa [#allocation3], 1 }
  0x4a   :  { %117 = vsyncpa [#allocation4], 1 }
  0x4b   :  { %118 = vsyncpa [#allocation5], 1 }

</bundles_post_ra>
